<compile_context>
chip_gen: v7x
topology: tpu7x:2x2x1
jax: 0.10.0
libtpu: 0.0.40
codegen_flags: <defaults>
</compile_context>

<pallas_src>
import jax
import jax.numpy as jnp
from jax.experimental import pallas as pl
from jax.experimental.pallas import tpu as pltpu

# Below this channel count the contraction is done on the VPU (broadcast FMAs)
# instead of the MXU -- a 4x8 contraction uses a negligible slice of a
# 128x128 / 256x256 systolic array and would pay MXU fill/drain per tile.
_VPU_CIN_THRESHOLD = 16


def _conv1x1_kernel(x_ref, w_ref, b_ref, o_ref):
    # x_ref: (1, C_in, TM)   w_ref: (C_out, C_in)
    # b_ref: (C_out, 1)      o_ref: (1, C_out, TM)
    xf = x_ref[0].astype(jnp.float32)       # (C_in, TM)   spatial on lanes
    wf = w_ref[...].astype(jnp.float32)     # (C_out, C_in)
    bf = b_ref[...].astype(jnp.float32)     # (C_out, 1)   broadcast along lanes

    c_in = xf.shape[0]
    if c_in <= _VPU_CIN_THRESHOLD:
        # VPU path: out[o, m] = sum_c w[o, c] * x[c, m] + b[o]
        # (C_out,1) * (1,TM) broadcasts are lane/sublane broadcasts -> pure VPU.
        acc = wf[:, 0:1] * xf[0:1, :] + bf
        for c in range(1, c_in):
            acc = acc + wf[:, c:c + 1] * xf[c:c + 1, :]
    else:
        # MXU path for real channel counts; f32 accumulation, f32 epilogue.
        acc = jnp.dot(wf, xf, preferred_element_type=jnp.float32) + bf

    o_ref[0] = acc.astype(o_ref.dtype)


def identity_forward(x_nchw, weight, bias, stride):
    """Forward pass of Identity: 1x1 strided conv with bias (NCHW in/out).

    x_nchw : (N, C_in, H, W)          float32
    weight : (C_out, C_in, 1, 1)      float32  (PyTorch OIHW conv weight)
    bias   : (C_out,)                 float32
    returns: (N, C_out, H_out, W_out) float32
    """
    n, c_in, _, _ = x_nchw.shape
    c_out = weight.shape[0]

    # Spatial part of the strided 1x1 conv.  This is the only pre-kernel copy;
    # everything below is transpose-free (reshapes of contiguous axes).
    x_s = x_nchw if stride == 1 else x_nchw[:, :, ::stride, ::stride]
    h_o, w_o = x_s.shape[2], x_s.shape[3]
    m = h_o * w_o

    x_flat = x_s.reshape(n, c_in, m)           # (N, C_in, M)  channels-first
    w_mat = weight.reshape(c_out, c_in)        # (C_out, C_in)
    b_mat = bias.reshape(c_out, 1)             # (C_out, 1)

    # Lane-axis (spatial) tile: multiple of 128, capped at 512 so the
    # double-buffered f32 blocks stay tiny even on v7x's 64 MiB VMEM.
    lane_tile_target = 512
    if m <= lane_tile_target or m % 128 != 0:
        tm = m                                  # full extent -- always legal
    else:
        tm = lane_tile_target                   # multiple of 128
    n_m_tiles = pl.cdiv(m, tm)

    out_flat = pl.pallas_call(
        _conv1x1_kernel,
        out_shape=jax.ShapeDtypeStruct((n, c_out, m), x_nchw.dtype),
        grid=(n, n_m_tiles),
        in_specs=[
            pl.BlockSpec((1, c_in, tm), lambda bi, mj: (bi, 0, mj)),
            pl.BlockSpec((c_out, c_in), lambda bi, mj: (0, 0)),
            pl.BlockSpec((c_out, 1), lambda bi, mj: (0, 0)),
        ],
        out_specs=pl.BlockSpec((1, c_out, tm), lambda bi, mj: (bi, 0, mj)),
        compiler_params=pltpu.CompilerParams(
            dimension_semantics=("parallel", "parallel")),
    )(x_flat, w_mat, b_mat)

    # (N, C_out, M) -> (N, C_out, Ho, Wo): pure reshape, no transpose.
    return out_flat.reshape(n, c_out, h_o, w_o)


if __name__ == "__main__":
    # Module hyperparameters (small, consistent with the PyTorch __init__)
    in_channels = 4
    expansion = 2
    stride = 2
    out_channels = in_channels * expansion

    key = jax.random.PRNGKey(0)
    kx, kw, kb = jax.random.split(key, 3)

    # deterministic synthetic parameters (conv weight layout: OIHW with k=1)
    x = jax.random.normal(kx, (2, in_channels, 16, 16), dtype=jnp.float32)
    weight = jax.random.normal(kw, (out_channels, in_channels, 1, 1),
                               dtype=jnp.float32) * 0.1
    bias = jax.random.normal(kb, (out_channels,), dtype=jnp.float32) * 0.1

    out = identity_forward(x, weight, bias, stride)
    out = jax.block_until_ready(out)

    # sanity check against a pure-JAX reference of the same conv
    ref = jax.lax.conv_general_dilated(
        x, weight, window_strides=(stride, stride), padding="VALID",
        dimension_numbers=("NCHW", "OIHW", "NCHW"),
    ) + bias.reshape(1, -1, 1, 1)
    assert out.shape == ref.shape == (2, out_channels, 8, 8)
    assert jnp.allclose(out, ref, atol=1e-5, rtol=1e-5)

    print("KERNEL_OK")
</pallas_src>

<mosaic_0001>
module attributes {stable_mosaic.version = 11 : i64} {
  func.func @_conv1x1_kernel(%arg0: i32, %arg1: i32, %arg2: memref<1x4x64xf32, #tpu.memory_space<vmem>>, %arg3: memref<8x4xf32, #tpu.memory_space<vmem>>, %arg4: memref<8x1xf32, #tpu.memory_space<vmem>>, %arg5: memref<1x8x64xf32, #tpu.memory_space<vmem>>) attributes {dimension_semantics = [#tpu.dimension_semantics<parallel>, #tpu.dimension_semantics<parallel>], iteration_bounds = array<i64: 2, 1>, scalar_prefetch = 0 : i64, scratch_operands = 0 : i64, tpu.core_type = #tpu.core_type<tc>, window_params = [{transform_indices = @transform_0, window_bounds = array<i64: 1, 4, 64>}, {pipeline_mode = #tpu.pipeline_mode<synchronous>, transform_indices = @transform_1, window_bounds = array<i64: 8, 4>}, {pipeline_mode = #tpu.pipeline_mode<synchronous>, transform_indices = @transform_2, window_bounds = array<i64: 8, 1>}, {transform_indices = @transform_3, window_bounds = array<i64: 1, 8, 64>}]} {
    %c0 = arith.constant 0 : index
    %c0_0 = arith.constant 0 : index
    %c0_1 = arith.constant 0 : index
    %0 = vector.load %arg2[%c0, %c0_0, %c0_1] : memref<1x4x64xf32, #tpu.memory_space<vmem>>, vector<1x4x64xf32>
    %1 = vector.shape_cast %0 : vector<1x4x64xf32> to vector<4x64xf32>
    %c0_2 = arith.constant 0 : index
    %c0_3 = arith.constant 0 : index
    %2 = vector.load %arg3[%c0_2, %c0_3] : memref<8x4xf32, #tpu.memory_space<vmem>>, vector<8x4xf32>
    %c0_4 = arith.constant 0 : index
    %c0_5 = arith.constant 0 : index
    %3 = vector.load %arg4[%c0_4, %c0_5] : memref<8x1xf32, #tpu.memory_space<vmem>>, vector<8x1xf32>
    %4 = vector.extract_strided_slice %2 {offsets = [0, 0], sizes = [8, 1], strides = [1, 1]} : vector<8x4xf32> to vector<8x1xf32>
    %5 = vector.extract_strided_slice %1 {offsets = [0, 0], sizes = [1, 64], strides = [1, 1]} : vector<4x64xf32> to vector<1x64xf32>
    %6 = vector.broadcast %4 : vector<8x1xf32> to vector<8x64xf32>
    %7 = vector.broadcast %5 : vector<1x64xf32> to vector<8x64xf32>
    %8 = arith.mulf %6, %7 : vector<8x64xf32>
    %9 = vector.broadcast %3 : vector<8x1xf32> to vector<8x64xf32>
    %10 = arith.addf %8, %9 : vector<8x64xf32>
    %11 = vector.extract_strided_slice %2 {offsets = [0, 1], sizes = [8, 1], strides = [1, 1]} : vector<8x4xf32> to vector<8x1xf32>
    %12 = vector.extract_strided_slice %1 {offsets = [1, 0], sizes = [1, 64], strides = [1, 1]} : vector<4x64xf32> to vector<1x64xf32>
    %13 = vector.broadcast %11 : vector<8x1xf32> to vector<8x64xf32>
    %14 = vector.broadcast %12 : vector<1x64xf32> to vector<8x64xf32>
    %15 = arith.mulf %13, %14 : vector<8x64xf32>
    %16 = arith.addf %10, %15 : vector<8x64xf32>
    %17 = vector.extract_strided_slice %2 {offsets = [0, 2], sizes = [8, 1], strides = [1, 1]} : vector<8x4xf32> to vector<8x1xf32>
    %18 = vector.extract_strided_slice %1 {offsets = [2, 0], sizes = [1, 64], strides = [1, 1]} : vector<4x64xf32> to vector<1x64xf32>
    %19 = vector.broadcast %17 : vector<8x1xf32> to vector<8x64xf32>
    %20 = vector.broadcast %18 : vector<1x64xf32> to vector<8x64xf32>
    %21 = arith.mulf %19, %20 : vector<8x64xf32>
    %22 = arith.addf %16, %21 : vector<8x64xf32>
    %23 = vector.extract_strided_slice %2 {offsets = [0, 3], sizes = [8, 1], strides = [1, 1]} : vector<8x4xf32> to vector<8x1xf32>
    %24 = vector.extract_strided_slice %1 {offsets = [3, 0], sizes = [1, 64], strides = [1, 1]} : vector<4x64xf32> to vector<1x64xf32>
    %25 = vector.broadcast %23 : vector<8x1xf32> to vector<8x64xf32>
    %26 = vector.broadcast %24 : vector<1x64xf32> to vector<8x64xf32>
    %27 = arith.mulf %25, %26 : vector<8x64xf32>
    %28 = arith.addf %22, %27 : vector<8x64xf32>
    %c0_6 = arith.constant 0 : index
    %c0_7 = arith.constant 0 : index
    %c0_8 = arith.constant 0 : index
    %29 = vector.load %arg5[%c0_6, %c0_7, %c0_8] : memref<1x8x64xf32, #tpu.memory_space<vmem>>, vector<1x8x64xf32>
    %30 = vector.shape_cast %29 : vector<1x8x64xf32> to vector<8x64xf32>
    %31 = vector.shape_cast %28 : vector<8x64xf32> to vector<1x8x64xf32>
    tpu.vector_store %arg5[%c0_6, %c0_7, %c0_8], %31 {strides = array<i32>} : memref<1x8x64xf32, #tpu.memory_space<vmem>>, vector<1x8x64xf32>,
    return
  }
  func.func @transform_0(%arg0: i32, %arg1: i32) -> (i32, i32, i32) {
    %c0_i32 = arith.constant 0 : i32
    %c0_i32_0 = arith.constant 0 : i32
    return %arg0, %c0_i32, %arg1 : i32, i32, i32
  }
  func.func @transform_1(%arg0: i32, %arg1: i32) -> (i32, i32) {
    %c0_i32 = arith.constant 0 : i32
    %c0_i32_0 = arith.constant 0 : i32
    %c0_i32_1 = arith.constant 0 : i32
    return %c0_i32, %c0_i32_0 : i32, i32
  }
  func.func @transform_2(%arg0: i32, %arg1: i32) -> (i32, i32) {
    %c0_i32 = arith.constant 0 : i32
    %c0_i32_0 = arith.constant 0 : i32
    %c0_i32_1 = arith.constant 0 : i32
    return %c0_i32, %c0_i32_0 : i32, i32
  }
  func.func @transform_3(%arg0: i32, %arg1: i32) -> (i32, i32, i32) {
    %c0_i32 = arith.constant 0 : i32
    %c0_i32_0 = arith.constant 0 : i32
    return %arg0, %c0_i32, %arg1 : i32, i32, i32
  }
}

</mosaic_0001>

<bundles_post_ra>
// kernel: tpu_custom_call.1
= control target key start
LH: loop header
LB: loop body
LE: loop exit
PB: predicated region body
PF: predicated region fallthrough
CT: control target
= control target key end

     0   :  { %8 = vsyncpa [#allocation3], 0  ;;  %s625_s0 = inlined_call_operand.vmem [shape: f32[2,4,64], index: 0, kind: input, shape index: {}]   ;;  %s626_s1 = inlined_call_operand.vmem [shape: f32[8,4], index: 1, kind: input, shape index: {}]   ;;  %s627_s2 = inlined_call_operand.vmem [shape: f32[8,1], index: 2, kind: input, shape index: {}]   ;;  %s628_s3 = inlined_call_operand.hbm [shape: f32[2,8,64], index: 3, kind: output, shape index: {}]  }
   0x1   :  { %10 = vsyncpa [#allocation3 + $0x1], 0  ;;  %s507_s12 = smov 0   ;;  %s509_s13 = smov 0  }
   0x2   :  { %s511_s14 = smov 0   ;;  %s513_s15 = smov 0  }
   0x3   :  { %s515_s16 = smov 0   ;;  %s517_s17 = smov 0  }
   0x4 LB: > { %s328_s18 = sadd.s32 4294967295, %s480_s17   ;;  %s329_s19 = sadd.s32 4294967294, %s480_s17   ;;  %s480_s17 = sphi %s517_s17, %s16_s17   ;;  %s476_s16 = sphi %s515_s16, %s635_s16   ;;  %s472_s15 = sphi %s513_s15, %s634_s15   ;;  %s468_s14 = sphi %s511_s14, %s633_s14   ;;  %s464_s13 = sphi %s509_s13, %s632_s13   ;;  %s460_s12 = sphi %s507_s12, %s631_s12  }
   0x5   : > { %s28_s20 = sadd.s32 1, %s476_s16  ;;  %s107_s21 = sadd.s32 1, %s468_s14 }
   0x6   : > { %p30_p0 = scmp.ge.s32.totalorder %s28_s20, 2  ;;  %p117_p1 = scmp.ne.s32.totalorder %s468_s14, %s464_s13 }
   0x7   : > { %p118_p2 = scmp.eq.s32.totalorder %s328_s18, 1  ;;  %p123_p3 = scmp.ne.s32.totalorder %s464_s13, %s460_s12 }
   0x8   : > { %s637_s20 = smov (%p30_p0, %s28_s20), 0  ;;  %p124_p5 = scmp.eq.s32.totalorder %s329_s19, 1 }
   0x9   : > { %p547_p4 = por %p118_p2, %p117_p1  ;;  %s102_s23 = ssub.s32 %s476_s16, %s637_s20 }
   0xa   : > { %p332_p6 = scmp.ge.s32.totalorder %s480_s17, 1  ;;  %p105_p7 = scmp.eq.s32.totalorder %s102_s23, 0 }
   0xb   : > { %p554_p8 = por %p124_p5, %p123_p3  ;;  %p158_p9 = scmp.lt.s32.totalorder %s480_s17, 3 }
   0xc   : > { %s560_s25 = scalar_select %p105_p7, %s468_s14, %s107_s21  }
   0xd   : > { %p159_p10 = pnand %p332_p6, %p158_p9 }
   0xe   : > { %v192_v0 = vld [vmem:[%s626_s1] sm:$0xff] (!%p159_p10)  ;;  %v482_v1 = vmov (!%p159_p10), 0   ;;  %v483_v2 = vmov (!%p159_p10), 1   ;;  %v484_v4 = vmov (!%p159_p10), 2   ;;  %v485_v5 = vmov (!%p159_p10), 3   ;;  %p184_p11 = scmp.lt.s32.totalorder (!%p159_p10), %s472_s15, 1 }
   0xf   : > { %162 = sbr.rel (%p159_p10) target bundleno = 171 (0xab), region = 32  ;;  %398 = vset.pattern.permute.xlu0 (!%p159_p10), %v482_v1  ;;  %399 = vset.pattern.permute.xlu1 (!%p159_p10), %v483_v2  ;;  %v193_v3 = vld [vmem:[%s627_s2] sm:$0xff] (!%p159_p10)  ;;  %v199_v6 = vlaneseq (!%p159_p10)  ;;  %s181_s8 = sand.u32 (!%p159_p10), 1, %s464_s13   ;;  %vm240_vm0 = vcmask (!%p159_p10), 523264  }
  0x10   : > { %196 = vperm.xlu0 (!%p159_p10), %398, %v192_v0   ;;  %211 = vperm.xlu1 (!%p159_p10), %399, %v192_v0   ;;  %s333_s9 = sshll.u32 (!%p159_p10), %s181_s8, 3  ;;  %s336_s10 = sshll.u32 (!%p159_p10), %s472_s15, 7 }
  0x11   : > { %v200_v7 = vshrl.u32 (!%p159_p10), %v199_v6, 7  ;;  %s183_s11 = scalar_lea.vmem (!%p159_p10), [#allocation2], %s333_s9  ;;  %s578_s23 = scalar_lea.hbm (!%p159_p10), %s628_s3, %s336_s10 }
  0x12   : > { %s257_s18 = sshll.u32 (!%p159_p10), %s183_s11, 4  ;;  %s243_s26 = scalar_lea.sflag (!%p159_p10), [#allocation3], %s181_s8  ;;  %s580_s18 = int_to_ptr.vmem [resolvable:$true] %s257_s18 }
  0x13   : > { %v201_v8 = vsub.s32 (!%p159_p10), 0, %v200_v7  ;;  %v216_v10 = vsub.s32 (!%p159_p10), 1, %v200_v7  ;;  %v226_v11 = vsub.s32 (!%p159_p10), 2, %v200_v7  ;;  %v236_v17 = vsub.s32 (!%p159_p10), 3, %v200_v7  ;;  %s402_s27 = scalar_lea.vmem (!%p159_p10), %s580_s18, 128 }
  0x14   : > { %206 = vperm.xlu0 (!%p159_p10), %398, %v193_v3   ;;  %400 = vset.pattern.permute.xlu1 (!%p159_p10), %v484_v4  ;;  %p403_p12 = scmp.ne.s32.totalorder (!%p159_p10), %s580_s18, %s402_s27 }
  0x15   : > { %221 = vperm.xlu1 (!%p159_p10), %400, %v192_v0  }
  0x16   : > { %s185_s30 = scalar_select %p184_p11, %s472_s15, 1 }
  0x17   : > { %p404_p13 = pnand %p403_p12, %p547_p4  ;;  %s486_s15 = smov [#allocation2]  }
  0x18   : > { %401 = vset.pattern.permute.xlu0 %v485_v5  ;;  %s334_s4 = sshll.u32 %s185_s30, 2  ;;  %s406_s28 = sshll.u32 %s486_s15, 4  ;;  %s407_s28 = int_to_ptr.vmem [resolvable:$false] %s406_s28 }
  0x19   : > { %231 = vperm.xlu0 %401, %v192_v0   ;;  %s190_s7 = scalar_lea.vmem %s625_s0, %s334_s4  ;;  %p405_p0 = pneg %p404_p13 }
  0x1a   : > { %v191_v9 = vld [vmem:[%s190_s7] sm:$0xf]  ;;  %s408_s29 = scalar_lea.vmem %s407_s28, 256  ;;  %p409_p1 = scmp.lt.s32.totalorder %s580_s18, %s407_s28 }
  0x1b   : > { %v202_v12 = vrot.slane %v191_v9, %v201_v8  ;;  %v217_v15 = vrot.slane %v191_v9, %v216_v10  ;;  %v227_v16 = vrot.slane %v191_v9, %v226_v11  ;;  %v237_v24 = vrot.slane %v191_v9, %v236_v17  ;;  %p410_p2 = scmp.lt.s32.totalorder %s408_s29, %s402_s27 }
  0x1d   : > { %p411_p3 = por %p410_p2, %p409_p1 }
  0x1f   : > { %p412_p5 = pnand %p411_p3, %p405_p0 }
  0x8f   : > { %v197_v13 = vpop.permute.xlu0 %196  ;;  %v212_v14 = vpop.permute.xlu1 %211 }
  0x90   : > { %v203_v18 = vmul.f32 %v202_v12, %v197_v13  ;;  %v218_v20 = vmul.f32 %v217_v15, %v212_v14 }
  0x93   : > { %v207_v19 = vpop.permute.xlu0 %206 }
  0x94   : > { %v209_v21 = vadd.f32 %v207_v19, %v203_v18  ;;  %v222_v22 = vpop.permute.xlu1 %221 }
  0x95   : > { %v228_v23 = vmul.f32 %v227_v16, %v222_v22 }
  0x96   : > { %v219_v25 = vadd.f32 %v218_v20, %v209_v21 }
  0x98   : > { %v229_v26 = vadd.f32 %v228_v23, %v219_v25  ;;  %v232_v27 = vpop.permute.xlu0 %231 }
  0x99   : > { %v238_v28 = vmul.f32 %v237_v24, %v232_v27 }
  0x9b   : > { %v239_v29 = vadd.f32 %v238_v28, %v229_v26 }
  0x9d   : > { %241 = vst.msk [vmem:[%s183_s11] sm:$0xff] %vm240_vm0, %v239_v29 }
  0x9e   : > { %415 = shalt.err (!%p412_p5)
}
  0x9f   : > { %s416_s30 = scalar_lea.hbm %s578_s23, 128  ;;  %s420_s6 = scalar_lea.hbm %s628_s3, 256 }
  0xa0   : > { %p417_p6 = scmp.ne.s32.totalorder %s578_s23, %s416_s30  ;;  %p421_p10 = scmp.lt.u32.totalorder %s578_s23, %s628_s3 }
  0xa1   : > { %p422_p11 = scmp.lt.u32.totalorder %s420_s6, %s416_s30  ;;  %p424_p13 = scmp.lt.u32.totalorder %s416_s30, %s578_s23 }
  0xa2   : > { %p418_p7 = pnand %p417_p6, %p547_p4 }
  0xa3   : > { %p423_p12 = por %p422_p11, %p421_p10 }
  0xa4   : > { %p419_p9 = pneg %p418_p7 }
  0xa5   : > { %p425_p0 = por %p424_p13, %p423_p12 }
  0xa7   : > { %p426_p1 = pnand %p425_p0, %p419_p9 }
  0xa9   : > { %429 = shalt.err (!%p426_p1)
}
  0xaa   : > { %339 = dma.vmem_to_hbm [thread:$0]  (%p547_p4), %s580_s18, 128, %s578_s23, %s243_s26  }
  0xab PF: > { %p345_p2 = scmp.ge.s32.totalorder %s480_s17, 2  ;;  %s269_s9 = sand.u32 1, %s460_s12  }
  0xac   : > { %s270_s10 = scalar_lea.sflag [#allocation3], %s269_s9 }
  0xad   : > { %p342_p3 = pnand %p345_p2, %p554_p8 }
  0xaf   : > { %455 = dma.done.wait (!%p342_p3), %s270_s10, 128  }
  0xb0   : > { %457 = vsyncadd (!%p342_p3), %s270_s10, 4294967168  ;;  %s16_s17 = sadd.s32 1, %s480_s17   ;;  %s631_s12 = smov %s464_s13 }
  0xb1   : > { %p13_p5 = scmp.ge.s32.totalorder %s16_s17, 4   ;;  %s632_s13 = smov %s468_s14 }
  0xb2   : > { %s633_s14 = smov %s560_s25  ;;  %s634_s15 = smov %s476_s16 }
  0xb3   : > { %s635_s16 = smov %s637_s20  ;;  %15 = sbr.rel (!%p13_p5) target bundleno = 4 (0x4), region = 67 }
  0xba   :  { %275 = vsyncpa [#allocation3], 1 }
  0xbb   :  { %277 = vsyncpa [#allocation3 + $0x1], 1 }

</bundles_post_ra>
